<compile_context>
chip_gen: v7x
topology: tpu7x:2x2x1
jax: 0.10.0
libtpu: 0.0.40
codegen_flags: <defaults>
</compile_context>

<pallas_src>
import jax
import jax.numpy as jnp
from jax.experimental import pallas as pl
from jax.experimental.pallas import tpu as pltpu


def _round_up(n, m):
    return ((n + m - 1) // m) * m


def dqn_kernel(x_ref, w1_ref, w2_ref, w3_ref, b_ref, o_ref):
    hidden = w2_ref.shape[0]
    out_pad = o_ref.shape[1]

    # Static slices of the fused bias tile (f32).
    b1 = b_ref[0:1, 0:hidden]
    b2 = b_ref[1:2, 0:hidden]
    b3 = b_ref[2:3, 0:out_pad]

    # fc1 + relu : bf16 MXU inputs, f32 accumulate, f32 elementwise.
    h1 = jnp.dot(x_ref[...], w1_ref[...], preferred_element_type=jnp.float32)
    h1 = jnp.maximum(h1 + b1, 0.0)

    # fc2 + relu
    h2 = jnp.dot(h1.astype(jnp.bfloat16), w2_ref[...],
                 preferred_element_type=jnp.float32)
    h2 = jnp.maximum(h2 + b2, 0.0)

    # fc3 (no activation) -> lane-dense padded store.
    out = jnp.dot(h2.astype(jnp.bfloat16), w3_ref[...],
                  preferred_element_type=jnp.float32)
    o_ref[...] = (out + b3).astype(o_ref.dtype)


def dqn_forward(x, params):
    """x: (B, input_dim) float32. params: dict of w1,b1,w2,b2,w3,b3 (float32)."""
    w1, b1 = params["w1"], params["b1"]
    w2, b2 = params["w2"], params["b2"]
    w3, b3 = params["w3"], params["b3"]

    B, input_dim = x.shape
    hidden = w1.shape[1]
    output_dim = w3.shape[1]

    # Lane-dense output: pad output feature dim to a multiple of 128.
    out_pad = _round_up(output_dim, 128)
    # Batch tile: multiple of 8 sublanes, capped at 512 rows per grid step.
    tb = min(512, _round_up(B, 8))
    b_pad = _round_up(B, tb)
    num_tiles = b_pad // tb

    # bf16 MXU operands; biases stay f32.
    x_p = jnp.zeros((b_pad, input_dim), jnp.bfloat16).at[:B].set(
        x.astype(jnp.bfloat16))
    w1_b = w1.astype(jnp.bfloat16)
    w2_b = w2.astype(jnp.bfloat16)
    w3_b = jnp.zeros((hidden, out_pad), jnp.bfloat16).at[:, :output_dim].set(
        w3.astype(jnp.bfloat16))

    # Fuse the three biases into one small f32 operand (one DMA).
    bias_w = max(hidden, out_pad)
    b_stack = jnp.zeros((3, bias_w), jnp.float32)
    b_stack = b_stack.at[0, :hidden].set(b1.reshape(-1))
    b_stack = b_stack.at[1, :hidden].set(b2.reshape(-1))
    b_stack = b_stack.at[2, :output_dim].set(b3.reshape(-1))

    flops = 2 * b_pad * (input_dim * hidden + hidden * hidden + hidden * out_pad)
    bytes_accessed = (x_p.size * 2 + w1_b.size * 2 + w2_b.size * 2
                      + w3_b.size * 2 + b_stack.size * 4 + b_pad * out_pad * 4)

    out = pl.pallas_call(
        dqn_kernel,
        out_shape=jax.ShapeDtypeStruct((b_pad, out_pad), jnp.float32),
        grid=(num_tiles,),
        in_specs=[
            pl.BlockSpec((tb, input_dim), lambda i: (i, 0)),       # x: blocked on batch
            pl.BlockSpec((input_dim, hidden), lambda i: (0, 0)),   # w1: VMEM-resident
            pl.BlockSpec((hidden, hidden), lambda i: (0, 0)),      # w2: VMEM-resident
            pl.BlockSpec((hidden, out_pad), lambda i: (0, 0)),     # w3 (padded): resident
            pl.BlockSpec((3, bias_w), lambda i: (0, 0)),           # fused biases
        ],
        out_specs=pl.BlockSpec((tb, out_pad), lambda i: (i, 0)),
        compiler_params=pltpu.CompilerParams(
            dimension_semantics=("parallel",)),
        cost_estimate=pl.CostEstimate(flops=flops, transcendentals=0,
                                      bytes_accessed=bytes_accessed),
    )(x_p, w1_b, w2_b, w3_b, b_stack)

    return out[:B, :output_dim]


def init_params(key, input_dim, output_dim, hidden=32):
    """Mimics PyTorch nn.Linear default init U(-1/sqrt(fan_in), 1/sqrt(fan_in))."""
    ks = jax.random.split(key, 6)

    def linear(kw, kb, fan_in, fan_out):
        bound = 1.0 / jnp.sqrt(fan_in)
        w = jax.random.uniform(kw, (fan_in, fan_out), jnp.float32, -bound, bound)
        b = jax.random.uniform(kb, (1, fan_out), jnp.float32, -bound, bound)
        return w, b

    w1, b1 = linear(ks[0], ks[1], input_dim, hidden)
    w2, b2 = linear(ks[2], ks[3], hidden, hidden)
    w3, b3 = linear(ks[4], ks[5], hidden, output_dim)
    return {"w1": w1, "b1": b1, "w2": w2, "b2": b2, "w3": w3, "b3": b3}


def dqn_reference(x, p):
    h1 = jnp.maximum(x @ p["w1"] + p["b1"], 0.0)
    h2 = jnp.maximum(h1 @ p["w2"] + p["b2"], 0.0)
    return h2 @ p["w3"] + p["b3"]


if __name__ == "__main__":
    key = jax.random.PRNGKey(0)
    k_x, k_p = jax.random.split(key)

    B, input_dim, output_dim = 8, 16, 4
    x = jax.random.normal(k_x, (B, input_dim), jnp.float32)
    params = init_params(k_p, input_dim, output_dim, hidden=32)

    out = dqn_forward(x, params)
    out = jax.block_until_ready(out)

    ref = dqn_reference(x, params)
    assert out.shape == (B, output_dim)
    # bf16 MXU operands (f32 accumulation) -> loosened tolerance vs the f32 reference.
    assert jnp.allclose(out, ref, atol=5e-2, rtol=5e-2), (
        f"max abs err {jnp.max(jnp.abs(out - ref))}")

    print("KERNEL_OK")
</pallas_src>

<mosaic_0001>
module attributes {stable_mosaic.version = 11 : i64} {
  func.func @dqn_kernel(%arg0: i32, %arg1: memref<8x16xbf16, #tpu.memory_space<vmem>>, %arg2: memref<16x32xbf16, #tpu.memory_space<vmem>>, %arg3: memref<32x32xbf16, #tpu.memory_space<vmem>>, %arg4: memref<32x128xbf16, #tpu.memory_space<vmem>>, %arg5: memref<3x128xf32, #tpu.memory_space<vmem>>, %arg6: memref<8x128xf32, #tpu.memory_space<vmem>>) attributes {dimension_semantics = [#tpu.dimension_semantics<parallel>], iteration_bounds = array<i64: 1>, scalar_prefetch = 0 : i64, scratch_operands = 0 : i64, tpu.core_type = #tpu.core_type<tc>, window_params = [{transform_indices = @transform_0, window_bounds = array<i64: 8, 16>}, {pipeline_mode = #tpu.pipeline_mode<synchronous>, transform_indices = @transform_1, window_bounds = array<i64: 16, 32>}, {pipeline_mode = #tpu.pipeline_mode<synchronous>, transform_indices = @transform_2, window_bounds = array<i64: 32, 32>}, {pipeline_mode = #tpu.pipeline_mode<synchronous>, transform_indices = @transform_3, window_bounds = array<i64: 32, 128>}, {pipeline_mode = #tpu.pipeline_mode<synchronous>, transform_indices = @transform_4, window_bounds = array<i64: 3, 128>}, {transform_indices = @transform_5, window_bounds = array<i64: 8, 128>}]} {
    %c0 = arith.constant 0 : index
    %c0_0 = arith.constant 0 : index
    %0 = vector.load %arg5[%c0, %c0_0] : memref<3x128xf32, #tpu.memory_space<vmem>>, vector<1x32xf32>
    %c1 = arith.constant 1 : index
    %c0_1 = arith.constant 0 : index
    %1 = vector.load %arg5[%c1, %c0_1] : memref<3x128xf32, #tpu.memory_space<vmem>>, vector<1x32xf32>
    %c2 = arith.constant 2 : index
    %c0_2 = arith.constant 0 : index
    %2 = vector.load %arg5[%c2, %c0_2] : memref<3x128xf32, #tpu.memory_space<vmem>>, vector<1x128xf32>
    %c0_3 = arith.constant 0 : index
    %c0_4 = arith.constant 0 : index
    %3 = vector.load %arg1[%c0_3, %c0_4] : memref<8x16xbf16, #tpu.memory_space<vmem>>, vector<8x16xbf16>
    %c0_5 = arith.constant 0 : index
    %c0_6 = arith.constant 0 : index
    %4 = vector.load %arg2[%c0_5, %c0_6] : memref<16x32xbf16, #tpu.memory_space<vmem>>, vector<16x32xbf16>
    %cst = arith.constant dense<0.000000e+00> : vector<8x32xf32>
    %5 = tpu.matmul %3, %4, %cst {dimension_numbers = #tpu.dot_dimension_numbers<[1], [0], [0], [1], [0, 0, 1, 1], [], []>} : vector<8x16xbf16>, vector<16x32xbf16>, vector<8x32xf32> -> vector<8x32xf32>
    %6 = vector.broadcast %0 : vector<1x32xf32> to vector<8x32xf32>
    %7 = arith.addf %5, %6 : vector<8x32xf32>
    %cst_7 = arith.constant 0.000000e+00 : f32
    %8 = vector.broadcast %cst_7 : f32 to vector<8x32xf32>
    %9 = arith.maximumf %7, %8 : vector<8x32xf32>
    %10 = arith.truncf %9 : vector<8x32xf32> to vector<8x32xbf16>
    %c0_8 = arith.constant 0 : index
    %c0_9 = arith.constant 0 : index
    %11 = vector.load %arg3[%c0_8, %c0_9] : memref<32x32xbf16, #tpu.memory_space<vmem>>, vector<32x32xbf16>
    %cst_10 = arith.constant dense<0.000000e+00> : vector<8x32xf32>
    %12 = tpu.matmul %10, %11, %cst_10 {dimension_numbers = #tpu.dot_dimension_numbers<[1], [0], [0], [1], [0, 0, 1, 1], [], []>} : vector<8x32xbf16>, vector<32x32xbf16>, vector<8x32xf32> -> vector<8x32xf32>
    %13 = vector.broadcast %1 : vector<1x32xf32> to vector<8x32xf32>
    %14 = arith.addf %12, %13 : vector<8x32xf32>
    %cst_11 = arith.constant 0.000000e+00 : f32
    %15 = vector.broadcast %cst_11 : f32 to vector<8x32xf32>
    %16 = arith.maximumf %14, %15 : vector<8x32xf32>
    %17 = arith.truncf %16 : vector<8x32xf32> to vector<8x32xbf16>
    %c0_12 = arith.constant 0 : index
    %c0_13 = arith.constant 0 : index
    %18 = vector.load %arg4[%c0_12, %c0_13] : memref<32x128xbf16, #tpu.memory_space<vmem>>, vector<32x128xbf16>
    %cst_14 = arith.constant dense<0.000000e+00> : vector<8x128xf32>
    %19 = tpu.matmul %17, %18, %cst_14 {dimension_numbers = #tpu.dot_dimension_numbers<[1], [0], [0], [1], [0, 0, 1, 1], [], []>} : vector<8x32xbf16>, vector<32x128xbf16>, vector<8x128xf32> -> vector<8x128xf32>
    %20 = vector.broadcast %2 : vector<1x128xf32> to vector<8x128xf32>
    %21 = arith.addf %19, %20 : vector<8x128xf32>
    %c0_15 = arith.constant 0 : index
    %c0_16 = arith.constant 0 : index
    %22 = vector.load %arg6[%c0_15, %c0_16] : memref<8x128xf32, #tpu.memory_space<vmem>>, vector<8x128xf32>
    tpu.vector_store %arg6[%c0_15, %c0_16], %21 {strides = array<i32>} : memref<8x128xf32, #tpu.memory_space<vmem>>, vector<8x128xf32>,
    return
  }
  func.func @transform_0(%arg0: i32) -> (i32, i32) {
    %c0_i32 = arith.constant 0 : i32
    %c0_i32_0 = arith.constant 0 : i32
    return %arg0, %c0_i32 : i32, i32
  }
  func.func @transform_1(%arg0: i32) -> (i32, i32) {
    %c0_i32 = arith.constant 0 : i32
    %c0_i32_0 = arith.constant 0 : i32
    %c0_i32_1 = arith.constant 0 : i32
    return %c0_i32, %c0_i32_0 : i32, i32
  }
  func.func @transform_2(%arg0: i32) -> (i32, i32) {
    %c0_i32 = arith.constant 0 : i32
    %c0_i32_0 = arith.constant 0 : i32
    %c0_i32_1 = arith.constant 0 : i32
    return %c0_i32, %c0_i32_0 : i32, i32
  }
  func.func @transform_3(%arg0: i32) -> (i32, i32) {
    %c0_i32 = arith.constant 0 : i32
    %c0_i32_0 = arith.constant 0 : i32
    %c0_i32_1 = arith.constant 0 : i32
    return %c0_i32, %c0_i32_0 : i32, i32
  }
  func.func @transform_4(%arg0: i32) -> (i32, i32) {
    %c0_i32 = arith.constant 0 : i32
    %c0_i32_0 = arith.constant 0 : i32
    %c0_i32_1 = arith.constant 0 : i32
    return %c0_i32, %c0_i32_0 : i32, i32
  }
  func.func @transform_5(%arg0: i32) -> (i32, i32) {
    %c0_i32 = arith.constant 0 : i32
    %c0_i32_0 = arith.constant 0 : i32
    return %arg0, %c0_i32 : i32, i32
  }
}

</mosaic_0001>

<bundles_post_ra>
// kernel: tpu_custom_call.1
= control target key start
LH: loop header
LB: loop body
LE: loop exit
PB: predicated region body
PF: predicated region fallthrough
CT: control target
= control target key end

     0   :  { %10 = vsyncpa [#allocation3], 0  ;;  %s574_s0 = inlined_call_operand.hbm [shape: bf16[8,16], index: 0, kind: input, shape index: {}]   ;;  %s575_s1 = inlined_call_operand.hbm [shape: bf16[16,32], index: 1, kind: input, shape index: {}]   ;;  %s576_s2 = inlined_call_operand.hbm [shape: bf16[32,32], index: 2, kind: input, shape index: {}]   ;;  %s577_s3 = inlined_call_operand.hbm [shape: bf16[32,128], index: 3, kind: input, shape index: {}]   ;;  %s578_s4 = inlined_call_operand.vmem [shape: f32[3,128], index: 4, kind: input, shape index: {}]   ;;  %s579_s5 = inlined_call_operand.hbm [shape: f32[8,128], index: 5, kind: output, shape index: {}]  }
   0x1   :  { %11 = vsyncpa [#allocation6], 0 }
   0x2   :  { %12 = vsyncpa [#allocation9], 0 }
   0x3   :  { %13 = vsyncpa [#allocation4], 0  ;;  %s457_s18 = smov [#allocation5]   ;;  %s339_s22 = scalar_lea.hbm %s575_s1, 128 }
   0x4   :  { %s29_s19 = sshll.u32 %s457_s18, 4  ;;  %p340_p0 = scmp.ne.s32.totalorder %s575_s1, %s339_s22  ;;  %s30_s19 = int_to_ptr.vmem [resolvable:$true] %s29_s19 }
   0x5   :  { %p343_p1 = scmp.lt.u32.totalorder %s339_s22, %s575_s1 }
   0x7   :  { %p345_p2 = pnand %p343_p1, %p340_p0 }
   0x9   :  { %348 = shalt.err (!%p345_p2)
}
   0xa   :  { %s349_s27 = scalar_lea.vmem %s30_s19, 128  ;;  %p354_p4 = scmp.lt.s32.totalorder %s30_s19, %s30_s19 }
   0xb   :  { %p350_p3 = scmp.ne.s32.totalorder %s30_s19, %s349_s27  ;;  %p355_p5 = scmp.lt.s32.totalorder %s349_s27, %s349_s27 }
   0xd   :  { %p356_p6 = por %p355_p5, %p354_p4 }
   0xf   :  { %p357_p7 = pnand %p356_p6, %p350_p3 }
  0x11   :  { %360 = shalt.err (!%p357_p7)
}
  0x12   :  { %s458_s28 = smov 64   ;;  %s459_s29 = smov 4  }
  0x13   :  { %35 = dma.hbm_to_vmem [thread:$0]  %s575_s1, 128, %s30_s19, [#allocation6], %s458_s28, %s458_s28, %s459_s29  }
  0x14   :  { %s460_s7 = smov [#allocation2]   ;;  %s461_s9 = smov [#allocation7]  }
  0x15   :  { %s20_s8 = sshll.u32 %s460_s7, 4  ;;  %s41_s10 = sshll.u32 %s461_s9, 4  ;;  %s21_s8 = int_to_ptr.vmem [resolvable:$true] %s20_s8  ;;  %s42_s10 = int_to_ptr.vmem [resolvable:$true] %s41_s10 }
  0x16   :  { %s361_s13 = scalar_lea.hbm %s574_s0, 64 }
  0x17   :  { %p362_p8 = scmp.ne.s32.totalorder %s574_s0, %s361_s13  ;;  %p365_p9 = scmp.lt.u32.totalorder %s361_s13, %s574_s0 }
  0x19   :  { %p367_p10 = pnand %p365_p9, %p362_p8 }
  0x1b   :  { %370 = shalt.err (!%p367_p10)
}
  0x1c   :  { %s371_s1 = scalar_lea.vmem %s21_s8, 64  ;;  %p376_p12 = scmp.lt.s32.totalorder %s21_s8, %s21_s8 }
  0x1d   :  { %p372_p11 = scmp.ne.s32.totalorder %s21_s8, %s371_s1  ;;  %p377_p13 = scmp.lt.s32.totalorder %s371_s1, %s371_s1 }
  0x1f   :  { %p378_p0 = por %p377_p13, %p376_p12 }
  0x21   :  { %p379_p1 = pnand %p378_p0, %p372_p11 }
  0x23   :  { %382 = shalt.err (!%p379_p1)
}
  0x24   :  { %23 = dma.hbm_to_vmem [thread:$0]  %s574_s0, 64, %s21_s8, [#allocation3]  }
  0x25   :  { %s383_s22 = scalar_lea.hbm %s576_s2, 256 }
  0x26   :  { %p384_p2 = scmp.ne.s32.totalorder %s576_s2, %s383_s22  ;;  %p387_p3 = scmp.lt.u32.totalorder %s383_s22, %s576_s2 }
  0x28   :  { %p389_p4 = pnand %p387_p3, %p384_p2 }
  0x2a   :  { %392 = shalt.err (!%p389_p4)
}
  0x2b   :  { %s393_s27 = scalar_lea.vmem %s42_s10, 256  ;;  %p398_p6 = scmp.lt.s32.totalorder %s42_s10, %s42_s10 }
  0x2c   :  { %p394_p5 = scmp.ne.s32.totalorder %s42_s10, %s393_s27  ;;  %p399_p7 = scmp.lt.s32.totalorder %s393_s27, %s393_s27 }
  0x2e   :  { %p400_p8 = por %p399_p7, %p398_p6 }
  0x30   :  { %p401_p9 = pnand %p400_p8, %p394_p5 }
  0x32   :  { %404 = shalt.err (!%p401_p9)
}
  0x33   :  { %47 = dma.hbm_to_vmem [thread:$0]  %s576_s2, 256, %s42_s10, [#allocation6], %s458_s28, %s458_s28, %s459_s29  }
  0x34   :  { %s462_s6 = smov [#allocation8]   ;;  %s405_s11 = scalar_lea.hbm %s577_s3, 256 }
  0x35   :  { %s53_s7 = sshll.u32 %s462_s6, 4  ;;  %p406_p10 = scmp.ne.s32.totalorder %s577_s3, %s405_s11  ;;  %s54_s7 = int_to_ptr.vmem [resolvable:$true] %s53_s7 }
  0x36   :  { %p409_p11 = scmp.lt.u32.totalorder %s405_s11, %s577_s3 }
  0x38   :  { %p411_p12 = pnand %p409_p11, %p406_p10 }
  0x3a   :  { %414 = shalt.err (!%p411_p12)
}
  0x3b   :  { %s415_s16 = scalar_lea.vmem %s54_s7, 256  ;;  %p420_p0 = scmp.lt.s32.totalorder %s54_s7, %s54_s7 }
  0x3c   :  { %p416_p13 = scmp.ne.s32.totalorder %s54_s7, %s415_s16  ;;  %p421_p1 = scmp.lt.s32.totalorder %s415_s16, %s415_s16 }
  0x3e   :  { %p422_p2 = por %p421_p1, %p420_p0 }
  0x40   :  { %p423_p3 = pnand %p422_p2, %p416_p13 }
  0x42   :  { %426 = shalt.err (!%p423_p3)
}
  0x43   :  { %59 = dma.hbm_to_vmem [thread:$0]  %s577_s3, 256, %s54_s7, [#allocation9], %s458_s28, %s458_s28, %s459_s29  }
  0x44   :  { %449 = dma.done.wait [#allocation3], 64  }
  0x45   :  { %450 = vsyncadd [#allocation3], 4294967232 }
  0x46   :  { %451 = dma.done.wait [#allocation6], 384  }
  0x47   :  { %452 = vsyncadd [#allocation6], 4294966912 }
  0x48   :  { %453 = dma.done.wait [#allocation9], 256  }
  0x49   :  { %454 = vsyncadd [#allocation9], 4294967040  ;;  %v463_v0 = vmov 0.0   ;;  %vm464_vm0 = vmmov 0   ;;  %v334_v1 = vld [vmem:[#allocation5] sm:$0xff]   ;;  %vm91_vm1 = vcmask 130048  }
  0x4a   :  { %303 = vmatprep.subr.bf16.mxu0 %v463_v0  ;;  %305 = vmatprep.mubr.msk.bf16.mxu0 %vm464_vm0, %v463_v0  ;;  %v78_v2 = vld [vmem:[#allocation2] sm:$0xf]  ;;  %v335_v3 = vld [vmem:[#allocation7] sm:$0xff]   ;;  %v336_v4 = vld [vmem:[#allocation7 + $0x8] sm:$0xff]   ;;  %vm157_vm2 = vcmask 261120   ;;  %s465_s19 = smov [#allocation10]  }
  0x4b   :  { %309 = vmatprep.subr.bf16.mxu1 %v463_v0  ;;  %313 = vmatprep.mubr.msk.bf16.mxu1 %vm464_vm0, %v463_v0  ;;  %v337_v5 = vld [vmem:[#allocation8] sm:$0xff]   ;;  %v338_v14 = vld [vmem:[#allocation8 + $0x8] sm:$0xff]   ;;  %s273_s20 = sshll.u32 %s465_s19, 4  ;;  %s274_s20 = int_to_ptr.vmem [resolvable:$true] %s273_s20 }
  0x4c   :  { %304 = vmatpush3.bf16.msra.mxu0 %v334_v1  ;;  %310 = vmatpush3.bf16.msra.mxu1 %v335_v3  ;;  %v284_v6 = vld [vmem:[%s578_s4] ss:$0 sm:$0xff]  ;;  %v287_v15 = vld [vmem:[%s578_s4 + $0x1] ss:$0 sm:$0xff]  ;;  %v291_v23 = vld [vmem:[%s578_s4 + $0x2] ss:$0 sm:$0xff]  ;;  %p432_p5 = scmp.lt.s32.totalorder %s274_s20, %s274_s20 }
  0x4d   :  { %317 = vmatprep.subr.bf16.mxu0 %v463_v0  ;;  %311 = vmatprep.subr.bf16.mxu1 %v463_v0  ;;  %s427_s21 = scalar_lea.vmem %s274_s20, 128 }
  0x4e   :  { %p428_p4 = scmp.ne.s32.totalorder %s274_s20, %s427_s21  ;;  %p433_p6 = scmp.lt.s32.totalorder %s427_s21, %s427_s21 }
  0x4f   :  { %306 = vmatmul.mubr.msk.bf16.vlgmr.msra.gmra.mrb[0].mxu0 %vm91_vm1, %v78_v2 }
  0x50   :  { %321 = vmatprep.mubr.msk.bf16.mxu0 %vm464_vm0, %v463_v0  ;;  %312 = vmatpush3.bf16.msra.mxu1 %v336_v4  ;;  %p434_p7 = por %p433_p6, %p432_p5 }
  0x51   :  { %318 = vmatpush3.bf16.msra.mxu0 %v337_v5 }
  0x52   :  { %319 = vmatprep.subr.bf16.mxu0 %v463_v0  ;;  %p435_p8 = pnand %p434_p7, %p428_p4 }
  0x55   :  { %320 = vmatpush3.bf16.msra.mxu0 %v338_v14 }
 0x122   :  { %v129_v7 = vpop.f32.mrb[0].mxu0 }
 0x123   :  { %v130_v8 = vadd.f32 %v284_v6, %v129_v7  ;;  %v307_v9 = vpop.f32.mrb[1].mxu0 }
 0x124   :  { %v132_v10 = vpop.f32.mrb[2].mxu0 }
 0x125   :  { %v135_v11 = vmax.f32 %v130_v8, 0.0  ;;  %v308_v12 = vpop.f32.mrb[3].mxu0 }
 0x127   :  { %v136_v13 = vpack.c.bf16 %v135_v11, %v135_v11 }
 0x129   :  { %314 = vmatmul.mubr.msk.bf16.vlgmr.msra.gmra.mrb[0].mxu1 %vm157_vm2, %v136_v13 }
 0x1fc   :  { %v195_v16 = vpop.f32.mrb[0].mxu1 }
 0x1fd   :  { %v196_v17 = vadd.f32 %v287_v15, %v195_v16  ;;  %v315_v18 = vpop.f32.mrb[1].mxu1 }
 0x1fe   :  { %v198_v19 = vpop.f32.mrb[2].mxu1 }
 0x1ff   :  { %v201_v20 = vmax.f32 %v196_v17, 0.0  ;;  %v316_v21 = vpop.f32.mrb[3].mxu1 }
 0x201   :  { %v202_v22 = vpack.c.bf16 %v201_v20, %v201_v20 }
 0x203   :  { %322 = vmatmul.mubr.msk.bf16.vlgmr.msra.gmra.mrb[4].mxu0 %vm157_vm2, %v202_v22 }
 0x2d6   :  { %v260_v24 = vpop.f32.mrb[4].mxu0 }
 0x2d7   :  { %v261_v25 = vadd.f32 %v291_v23, %v260_v24  ;;  %v323_v26 = vpop.f32.mrb[5].mxu0 }
 0x2d8   :  { %v263_v27 = vpop.f32.mrb[6].mxu0 }
 0x2d9   :  { %266 = vst [vmem:[#allocation10] sm:$0xff] %v261_v25  ;;  %v324_v28 = vpop.f32.mrb[7].mxu0 }
 0x2da   :  { %438 = shalt.err (!%p435_p8)
}
 0x2db   :  { %s439_s4 = scalar_lea.hbm %s579_s5, 128 }
 0x2dc   :  { %p440_p9 = scmp.ne.s32.totalorder %s579_s5, %s439_s4  ;;  %p443_p10 = scmp.lt.u32.totalorder %s439_s4, %s579_s5 }
 0x2de   :  { %p445_p11 = pnand %p443_p10, %p440_p9 }
 0x2e0   :  { %448 = shalt.err (!%p445_p11)
}
 0x2e1   :  { %276 = dma.vmem_to_hbm [thread:$0]  %s274_s20, 128, %s579_s5, [#allocation4]  }
 0x2e2   :  { %455 = dma.done.wait [#allocation4], 128  }
 0x2e3   :  { %456 = vsyncadd [#allocation4], 4294967168 }
 0x2e4   :  { %280 = vsyncpa [#allocation3], 1 }
 0x2e5   :  { %281 = vsyncpa [#allocation6], 1 }
 0x2e6   :  { %282 = vsyncpa [#allocation9], 1 }
 0x2e7   :  { %283 = vsyncpa [#allocation4], 1 }

</bundles_post_ra>
